<compile_context>
chip_gen: v6e
topology: v6e:2x2x1
jax: 0.10.0
libtpu: 0.0.40
codegen_flags: <defaults>
</compile_context>

<pallas_src>
import jax
import jax.numpy as jnp
from jax import lax
from jax.experimental import pallas as pl
from jax.experimental.pallas import tpu as pltpu


def _make_kernel(batch_block, Wp, Lv, KH, KW):
    # flat-pixel offset of each 3x3 tap inside the padded image (Python ints only)
    tap_offsets = tuple(dy * Wp + dx for dy in range(KH) for dx in range(KW))

    def kernel(x_ref, mask_ref, wc_ref, bc_ref, wh_ref, bh_ref, out_ref):
        # x_ref:    (batch_block, C, Hp*Wp)  padded input, pixels on the lane axis
        # mask_ref: (1, Lv)   1/(H*W) at valid output pixels, 0 at padded columns
        # wc_ref:   (KH*KW, COUT, C) conv weight regrouped per tap
        # bc_ref:   (COUT, 1);  wh_ref: (COUT, NOUT);  bh_ref: (1, NOUT)
        # out_ref:  (batch_block, 1, NOUT)
        for i in range(batch_block):                         # static unroll
            x = x_ref[i]                                     # (C, Hp*Wp)
            # in-kernel im2col: conv = sum over 9 taps of a (COUT,C)x(C,Lv) matmul,
            # each tap is a static shifted slice of the padded image (no host patches).
            f = None
            for t, off in enumerate(tap_offsets):
                contrib = jnp.dot(wc_ref[t], x[:, off:off + Lv],
                                  preferred_element_type=jnp.float32)   # (COUT, Lv)
                f = contrib if f is None else f + contrib
            f = jnp.maximum(f + bc_ref[...], 0.0)            # bias + ReLU, lane-dense
            # adaptive_avg_pool2d(., 1): masked mean over valid pixels as one MXU
            # contraction (mask already carries the 1/(H*W) scale) -> (1, COUT)
            g = lax.dot_general(mask_ref[...], f,
                                dimension_numbers=(((1,), (1,)), ((), ())),
                                preferred_element_type=jnp.float32)
            # Linear(16, 10)
            out = jnp.dot(g, wh_ref[...],
                          preferred_element_type=jnp.float32) + bh_ref[...]   # (1, NOUT)
            out_ref[i] = out

    return kernel


def _pick_batch_block(n, bytes_per_image, target_bytes=1 << 20, max_nb=8):
    """Images per grid step: large enough to amortize the ~0.35us step cost, but keep
    >= 2 grid steps whenever possible so the parallel batch axis feeds both v7x cores."""
    nb = int(max(1, min(max_nb, target_bytes // max(bytes_per_image, 1))))
    while nb > 1 and (n % nb != 0 or n // nb < 2):
        nb -= 1
    return nb


def conv_fc_net(x_nchw, w_conv, b_conv, w_head, b_head, *, batch_block=None):
    """x_nchw: (N, 3, H, W); w_conv: (16,3,3,3); b_conv: (16,);
    w_head: (10,16); b_head: (10,). Returns (N, 10) f32."""
    N, C, H, W = x_nchw.shape
    COUT, CIN, KH, KW = w_conv.shape
    assert CIN == C and (KH, KW) == (3, 3), "kernel assumes 3x3 conv with padding=1"
    NOUT = w_head.shape[0]
    Hp, Wp = H + 2, W + 2
    HpWp = Hp * Wp
    Lv = (H - 1) * Wp + W        # lanes covering every valid output pixel
    # note: max tap offset (2*Wp+2) + Lv == Hp*Wp, so every in-kernel slice is in bounds

    # host glue (~1x input traffic): spatial zero-pad, flatten pixels onto the lane axis
    xp = jnp.pad(x_nchw.astype(jnp.float32),
                 ((0, 0), (0, 0), (1, 1), (1, 1))).reshape(N, C, HpWp)

    # valid-pixel mask over the flat padded grid, pre-scaled by 1/(H*W) so the pooling
    # contraction inside the kernel directly yields the mean (no captured jnp constants).
    mask = jnp.where(jnp.arange(Lv, dtype=jnp.int32) % Wp < W,
                     1.0 / (H * W), 0.0).astype(jnp.float32).reshape(1, Lv)

    # conv weight regrouped per tap: wc[dy*KW+dx, co, ci] = w_conv[co, ci, dy, dx]
    wc = jnp.transpose(w_conv, (2, 3, 0, 1)).reshape(KH * KW, COUT, C).astype(jnp.float32)
    bc = b_conv.reshape(COUT, 1).astype(jnp.float32)
    wh = jnp.transpose(w_head).astype(jnp.float32)          # (COUT, NOUT)
    bh = b_head.reshape(1, NOUT).astype(jnp.float32)

    if batch_block is None:
        batch_block = _pick_batch_block(N, C * HpWp * 4)
    assert N % batch_block == 0, "batch_block must divide N"
    nsteps = N // batch_block

    kernel = _make_kernel(batch_block, Wp, Lv, KH, KW)

    out = pl.pallas_call(
        kernel,
        out_shape=jax.ShapeDtypeStruct((N, 1, NOUT), jnp.float32),
        grid=(nsteps,),
        in_specs=[
            pl.BlockSpec((batch_block, C, HpWp), lambda n: (n, 0, 0)),   # padded images
            pl.BlockSpec((1, Lv), lambda n: (0, 0)),                     # pooling mask
            pl.BlockSpec((KH * KW, COUT, C), lambda n: (0, 0, 0)),       # conv weights
            pl.BlockSpec((COUT, 1), lambda n: (0, 0)),                   # conv bias
            pl.BlockSpec((COUT, NOUT), lambda n: (0, 0)),                # head weights
            pl.BlockSpec((1, NOUT), lambda n: (0, 0)),                   # head bias
        ],
        out_specs=pl.BlockSpec((batch_block, 1, NOUT), lambda n: (n, 0, 0)),
        compiler_params=pltpu.CompilerParams(
            dimension_semantics=("parallel",),   # batch-parallel (v7x megacore)
        ),
    )(xp, mask, wc, bc, wh, bh)
    # TODO(synk): for very large H*W, tile each image into row strips with a 1-row halo
    # (manual pltpu.make_async_copy) instead of one whole padded image per grid step.
    return out.reshape(N, NOUT)


if __name__ == "__main__":
    key = jax.random.PRNGKey(0)
    k1, k2, k3, k4, k5 = jax.random.split(key, 5)

    N, C, H, W = 2, 3, 16, 16
    x = jax.random.normal(k1, (N, C, H, W), jnp.float32)
    # deterministic synthetic params matching nn.Conv2d(3,16,3) / nn.Linear(16,10) shapes
    w_conv = jax.random.normal(k2, (16, 3, 3, 3), jnp.float32) * 0.1
    b_conv = jax.random.normal(k3, (16,), jnp.float32) * 0.1
    w_head = jax.random.normal(k4, (10, 16), jnp.float32) * 0.1
    b_head = jax.random.normal(k5, (10,), jnp.float32) * 0.1

    out = conv_fc_net(x, w_conv, b_conv, w_head, b_head)
    out = jax.block_until_ready(out)
    assert out.shape == (N, 10)

    # pure-JAX f32 reference (same math as the PyTorch forward)
    f_ref = lax.conv_general_dilated(
        x, w_conv, window_strides=(1, 1), padding=((1, 1), (1, 1)),
        dimension_numbers=("NCHW", "OIHW", "NCHW"))
    f_ref = jnp.maximum(f_ref + b_conv[None, :, None, None], 0.0)
    g_ref = jnp.mean(f_ref, axis=(2, 3))
    ref = g_ref @ w_head.T + b_head

    err = jnp.max(jnp.abs(out - ref))
    assert jnp.allclose(out, ref, atol=2e-2, rtol=2e-2), f"max abs err {err}"
    print("KERNEL_OK")
</pallas_src>

<mosaic_0001>
module attributes {stable_mosaic.version = 11 : i64} {
  func.func @kernel(%arg0: i32, %arg1: memref<1x3x324xf32, #tpu.memory_space<vmem>>, %arg2: memref<1x286xf32, #tpu.memory_space<vmem>>, %arg3: memref<9x16x3xf32, #tpu.memory_space<vmem>>, %arg4: memref<16x1xf32, #tpu.memory_space<vmem>>, %arg5: memref<16x10xf32, #tpu.memory_space<vmem>>, %arg6: memref<1x10xf32, #tpu.memory_space<vmem>>, %arg7: memref<1x1x10xf32, #tpu.memory_space<vmem>>) attributes {dimension_semantics = [#tpu.dimension_semantics<parallel>], iteration_bounds = array<i64: 2>, scalar_prefetch = 0 : i64, scratch_operands = 0 : i64, tpu.core_type = #tpu.core_type<tc>, window_params = [{transform_indices = @transform_0, window_bounds = array<i64: 1, 3, 324>}, {pipeline_mode = #tpu.pipeline_mode<synchronous>, transform_indices = @transform_1, window_bounds = array<i64: 1, 286>}, {pipeline_mode = #tpu.pipeline_mode<synchronous>, transform_indices = @transform_2, window_bounds = array<i64: 9, 16, 3>}, {pipeline_mode = #tpu.pipeline_mode<synchronous>, transform_indices = @transform_3, window_bounds = array<i64: 16, 1>}, {pipeline_mode = #tpu.pipeline_mode<synchronous>, transform_indices = @transform_4, window_bounds = array<i64: 16, 10>}, {pipeline_mode = #tpu.pipeline_mode<synchronous>, transform_indices = @transform_5, window_bounds = array<i64: 1, 10>}, {transform_indices = @transform_6, window_bounds = array<i64: 1, 1, 10>}]} {
    %c0 = arith.constant 0 : index
    %c0_0 = arith.constant 0 : index
    %c0_1 = arith.constant 0 : index
    %0 = vector.load %arg1[%c0, %c0_0, %c0_1] : memref<1x3x324xf32, #tpu.memory_space<vmem>>, vector<1x3x324xf32>
    %1 = vector.shape_cast %0 : vector<1x3x324xf32> to vector<3x324xf32>
    %c0_2 = arith.constant 0 : index
    %c0_3 = arith.constant 0 : index
    %c0_4 = arith.constant 0 : index
    %2 = vector.load %arg3[%c0_2, %c0_3, %c0_4] : memref<9x16x3xf32, #tpu.memory_space<vmem>>, vector<1x16x3xf32>
    %3 = vector.shape_cast %2 : vector<1x16x3xf32> to vector<16x3xf32>
    %4 = vector.extract_strided_slice %1 {offsets = [0, 0], sizes = [3, 286], strides = [1, 1]} : vector<3x324xf32> to vector<3x286xf32>
    %cst = arith.constant dense<0.000000e+00> : vector<16x286xf32>
    %5 = tpu.matmul %3, %4, %cst {dimension_numbers = #tpu.dot_dimension_numbers<[1], [0], [0], [1], [0, 0, 1, 1], [], []>} : vector<16x3xf32>, vector<3x286xf32>, vector<16x286xf32> -> vector<16x286xf32>
    %c1 = arith.constant 1 : index
    %c0_5 = arith.constant 0 : index
    %c0_6 = arith.constant 0 : index
    %6 = vector.load %arg3[%c1, %c0_5, %c0_6] : memref<9x16x3xf32, #tpu.memory_space<vmem>>, vector<1x16x3xf32>
    %7 = vector.shape_cast %6 : vector<1x16x3xf32> to vector<16x3xf32>
    %8 = vector.extract_strided_slice %1 {offsets = [0, 1], sizes = [3, 286], strides = [1, 1]} : vector<3x324xf32> to vector<3x286xf32>
    %cst_7 = arith.constant dense<0.000000e+00> : vector<16x286xf32>
    %9 = tpu.matmul %7, %8, %cst_7 {dimension_numbers = #tpu.dot_dimension_numbers<[1], [0], [0], [1], [0, 0, 1, 1], [], []>} : vector<16x3xf32>, vector<3x286xf32>, vector<16x286xf32> -> vector<16x286xf32>
    %10 = arith.addf %5, %9 : vector<16x286xf32>
    %c2 = arith.constant 2 : index
    %c0_8 = arith.constant 0 : index
    %c0_9 = arith.constant 0 : index
    %11 = vector.load %arg3[%c2, %c0_8, %c0_9] : memref<9x16x3xf32, #tpu.memory_space<vmem>>, vector<1x16x3xf32>
    %12 = vector.shape_cast %11 : vector<1x16x3xf32> to vector<16x3xf32>
    %13 = vector.extract_strided_slice %1 {offsets = [0, 2], sizes = [3, 286], strides = [1, 1]} : vector<3x324xf32> to vector<3x286xf32>
    %cst_10 = arith.constant dense<0.000000e+00> : vector<16x286xf32>
    %14 = tpu.matmul %12, %13, %cst_10 {dimension_numbers = #tpu.dot_dimension_numbers<[1], [0], [0], [1], [0, 0, 1, 1], [], []>} : vector<16x3xf32>, vector<3x286xf32>, vector<16x286xf32> -> vector<16x286xf32>
    %15 = arith.addf %10, %14 : vector<16x286xf32>
    %c3 = arith.constant 3 : index
    %c0_11 = arith.constant 0 : index
    %c0_12 = arith.constant 0 : index
    %16 = vector.load %arg3[%c3, %c0_11, %c0_12] : memref<9x16x3xf32, #tpu.memory_space<vmem>>, vector<1x16x3xf32>
    %17 = vector.shape_cast %16 : vector<1x16x3xf32> to vector<16x3xf32>
    %18 = vector.extract_strided_slice %1 {offsets = [0, 18], sizes = [3, 286], strides = [1, 1]} : vector<3x324xf32> to vector<3x286xf32>
    %cst_13 = arith.constant dense<0.000000e+00> : vector<16x286xf32>
    %19 = tpu.matmul %17, %18, %cst_13 {dimension_numbers = #tpu.dot_dimension_numbers<[1], [0], [0], [1], [0, 0, 1, 1], [], []>} : vector<16x3xf32>, vector<3x286xf32>, vector<16x286xf32> -> vector<16x286xf32>
    %20 = arith.addf %15, %19 : vector<16x286xf32>
    %c4 = arith.constant 4 : index
    %c0_14 = arith.constant 0 : index
    %c0_15 = arith.constant 0 : index
    %21 = vector.load %arg3[%c4, %c0_14, %c0_15] : memref<9x16x3xf32, #tpu.memory_space<vmem>>, vector<1x16x3xf32>
    %22 = vector.shape_cast %21 : vector<1x16x3xf32> to vector<16x3xf32>
    %23 = vector.extract_strided_slice %1 {offsets = [0, 19], sizes = [3, 286], strides = [1, 1]} : vector<3x324xf32> to vector<3x286xf32>
    %cst_16 = arith.constant dense<0.000000e+00> : vector<16x286xf32>
    %24 = tpu.matmul %22, %23, %cst_16 {dimension_numbers = #tpu.dot_dimension_numbers<[1], [0], [0], [1], [0, 0, 1, 1], [], []>} : vector<16x3xf32>, vector<3x286xf32>, vector<16x286xf32> -> vector<16x286xf32>
    %25 = arith.addf %20, %24 : vector<16x286xf32>
    %c5 = arith.constant 5 : index
    %c0_17 = arith.constant 0 : index
    %c0_18 = arith.constant 0 : index
    %26 = vector.load %arg3[%c5, %c0_17, %c0_18] : memref<9x16x3xf32, #tpu.memory_space<vmem>>, vector<1x16x3xf32>
    %27 = vector.shape_cast %26 : vector<1x16x3xf32> to vector<16x3xf32>
    %28 = vector.extract_strided_slice %1 {offsets = [0, 20], sizes = [3, 286], strides = [1, 1]} : vector<3x324xf32> to vector<3x286xf32>
    %cst_19 = arith.constant dense<0.000000e+00> : vector<16x286xf32>
    %29 = tpu.matmul %27, %28, %cst_19 {dimension_numbers = #tpu.dot_dimension_numbers<[1], [0], [0], [1], [0, 0, 1, 1], [], []>} : vector<16x3xf32>, vector<3x286xf32>, vector<16x286xf32> -> vector<16x286xf32>
    %30 = arith.addf %25, %29 : vector<16x286xf32>
    %c6 = arith.constant 6 : index
    %c0_20 = arith.constant 0 : index
    %c0_21 = arith.constant 0 : index
    %31 = vector.load %arg3[%c6, %c0_20, %c0_21] : memref<9x16x3xf32, #tpu.memory_space<vmem>>, vector<1x16x3xf32>
    %32 = vector.shape_cast %31 : vector<1x16x3xf32> to vector<16x3xf32>
    %33 = vector.extract_strided_slice %1 {offsets = [0, 36], sizes = [3, 286], strides = [1, 1]} : vector<3x324xf32> to vector<3x286xf32>
    %cst_22 = arith.constant dense<0.000000e+00> : vector<16x286xf32>
    %34 = tpu.matmul %32, %33, %cst_22 {dimension_numbers = #tpu.dot_dimension_numbers<[1], [0], [0], [1], [0, 0, 1, 1], [], []>} : vector<16x3xf32>, vector<3x286xf32>, vector<16x286xf32> -> vector<16x286xf32>
    %35 = arith.addf %30, %34 : vector<16x286xf32>
    %c7 = arith.constant 7 : index
    %c0_23 = arith.constant 0 : index
    %c0_24 = arith.constant 0 : index
    %36 = vector.load %arg3[%c7, %c0_23, %c0_24] : memref<9x16x3xf32, #tpu.memory_space<vmem>>, vector<1x16x3xf32>
    %37 = vector.shape_cast %36 : vector<1x16x3xf32> to vector<16x3xf32>
    %38 = vector.extract_strided_slice %1 {offsets = [0, 37], sizes = [3, 286], strides = [1, 1]} : vector<3x324xf32> to vector<3x286xf32>
    %cst_25 = arith.constant dense<0.000000e+00> : vector<16x286xf32>
    %39 = tpu.matmul %37, %38, %cst_25 {dimension_numbers = #tpu.dot_dimension_numbers<[1], [0], [0], [1], [0, 0, 1, 1], [], []>} : vector<16x3xf32>, vector<3x286xf32>, vector<16x286xf32> -> vector<16x286xf32>
    %40 = arith.addf %35, %39 : vector<16x286xf32>
    %c8 = arith.constant 8 : index
    %c0_26 = arith.constant 0 : index
    %c0_27 = arith.constant 0 : index
    %41 = vector.load %arg3[%c8, %c0_26, %c0_27] : memref<9x16x3xf32, #tpu.memory_space<vmem>>, vector<1x16x3xf32>
    %42 = vector.shape_cast %41 : vector<1x16x3xf32> to vector<16x3xf32>
    %43 = vector.extract_strided_slice %1 {offsets = [0, 38], sizes = [3, 286], strides = [1, 1]} : vector<3x324xf32> to vector<3x286xf32>
    %cst_28 = arith.constant dense<0.000000e+00> : vector<16x286xf32>
    %44 = tpu.matmul %42, %43, %cst_28 {dimension_numbers = #tpu.dot_dimension_numbers<[1], [0], [0], [1], [0, 0, 1, 1], [], []>} : vector<16x3xf32>, vector<3x286xf32>, vector<16x286xf32> -> vector<16x286xf32>
    %45 = arith.addf %40, %44 : vector<16x286xf32>
    %c0_29 = arith.constant 0 : index
    %c0_30 = arith.constant 0 : index
    %46 = vector.load %arg4[%c0_29, %c0_30] : memref<16x1xf32, #tpu.memory_space<vmem>>, vector<16x1xf32>
    %47 = vector.broadcast %46 : vector<16x1xf32> to vector<16x286xf32>
    %48 = arith.addf %45, %47 : vector<16x286xf32>
    %cst_31 = arith.constant 0.000000e+00 : f32
    %49 = vector.broadcast %cst_31 : f32 to vector<16x286xf32>
    %50 = arith.maximumf %48, %49 : vector<16x286xf32>
    %c0_32 = arith.constant 0 : index
    %c0_33 = arith.constant 0 : index
    %51 = vector.load %arg2[%c0_32, %c0_33] : memref<1x286xf32, #tpu.memory_space<vmem>>, vector<1x286xf32>
    %cst_34 = arith.constant dense<0.000000e+00> : vector<1x16xf32>
    %52 = tpu.matmul %51, %50, %cst_34 {dimension_numbers = #tpu.dot_dimension_numbers<[1], [1], [0], [0], [0, 0, 1, 0], [], []>} : vector<1x286xf32>, vector<16x286xf32>, vector<1x16xf32> -> vector<1x16xf32>
    %c0_35 = arith.constant 0 : index
    %c0_36 = arith.constant 0 : index
    %53 = vector.load %arg5[%c0_35, %c0_36] : memref<16x10xf32, #tpu.memory_space<vmem>>, vector<16x10xf32>
    %cst_37 = arith.constant dense<0.000000e+00> : vector<1x10xf32>
    %54 = tpu.matmul %52, %53, %cst_37 {dimension_numbers = #tpu.dot_dimension_numbers<[1], [0], [0], [1], [0, 0, 1, 1], [], []>} : vector<1x16xf32>, vector<16x10xf32>, vector<1x10xf32> -> vector<1x10xf32>
    %c0_38 = arith.constant 0 : index
    %c0_39 = arith.constant 0 : index
    %55 = vector.load %arg6[%c0_38, %c0_39] : memref<1x10xf32, #tpu.memory_space<vmem>>, vector<1x10xf32>
    %56 = arith.addf %54, %55 : vector<1x10xf32>
    %c0_40 = arith.constant 0 : index
    %c0_41 = arith.constant 0 : index
    %c0_42 = arith.constant 0 : index
    %57 = vector.load %arg7[%c0_40, %c0_41, %c0_42] : memref<1x1x10xf32, #tpu.memory_space<vmem>>, vector<1x1x10xf32>
    %58 = vector.shape_cast %57 : vector<1x1x10xf32> to vector<1x10xf32>
    %59 = vector.shape_cast %56 : vector<1x10xf32> to vector<1x1x10xf32>
    tpu.vector_store %arg7[%c0_40, %c0_41, %c0_42], %59 {strides = array<i32>} : memref<1x1x10xf32, #tpu.memory_space<vmem>>, vector<1x1x10xf32>,
    return
  }
  func.func @transform_0(%arg0: i32) -> (i32, i32, i32) {
    %c0_i32 = arith.constant 0 : i32
    %c0_i32_0 = arith.constant 0 : i32
    %c0_i32_1 = arith.constant 0 : i32
    return %arg0, %c0_i32, %c0_i32_0 : i32, i32, i32
  }
  func.func @transform_1(%arg0: i32) -> (i32, i32) {
    %c0_i32 = arith.constant 0 : i32
    %c0_i32_0 = arith.constant 0 : i32
    %c0_i32_1 = arith.constant 0 : i32
    return %c0_i32, %c0_i32_0 : i32, i32
  }
  func.func @transform_2(%arg0: i32) -> (i32, i32, i32) {
    %c0_i32 = arith.constant 0 : i32
    %c0_i32_0 = arith.constant 0 : i32
    %c0_i32_1 = arith.constant 0 : i32
    %c0_i32_2 = arith.constant 0 : i32
    return %c0_i32, %c0_i32_0, %c0_i32_1 : i32, i32, i32
  }
  func.func @transform_3(%arg0: i32) -> (i32, i32) {
    %c0_i32 = arith.constant 0 : i32
    %c0_i32_0 = arith.constant 0 : i32
    %c0_i32_1 = arith.constant 0 : i32
    return %c0_i32, %c0_i32_0 : i32, i32
  }
  func.func @transform_4(%arg0: i32) -> (i32, i32) {
    %c0_i32 = arith.constant 0 : i32
    %c0_i32_0 = arith.constant 0 : i32
    %c0_i32_1 = arith.constant 0 : i32
    return %c0_i32, %c0_i32_0 : i32, i32
  }
  func.func @transform_5(%arg0: i32) -> (i32, i32) {
    %c0_i32 = arith.constant 0 : i32
    %c0_i32_0 = arith.constant 0 : i32
    %c0_i32_1 = arith.constant 0 : i32
    return %c0_i32, %c0_i32_0 : i32, i32
  }
  func.func @transform_6(%arg0: i32) -> (i32, i32, i32) {
    %c0_i32 = arith.constant 0 : i32
    %c0_i32_0 = arith.constant 0 : i32
    %c0_i32_1 = arith.constant 0 : i32
    return %arg0, %c0_i32, %c0_i32_0 : i32, i32, i32
  }
}

</mosaic_0001>

<bundles_post_ra>
// kernel: tpu_custom_call.1
= control target key start
LH: loop header
LB: loop body
LE: loop exit
PB: predicated region body
PF: predicated region fallthrough
CT: control target
= control target key end

     0   :  { %11 = vsyncpa [#allocation3], 0  ;;  %s2857_s0 = inlined_call_operand.vmem [shape: f32[2,3,324], index: 0, kind: input, shape index: {}]   ;;  %s2858_s1 = inlined_call_operand.vmem [shape: f32[1,286], index: 1, kind: input, shape index: {}]   ;;  %s2859_s2 = inlined_call_operand.vmem [shape: f32[9,16,3], index: 2, kind: input, shape index: {}]   ;;  %s2860_s3 = inlined_call_operand.vmem [shape: f32[16,1], index: 3, kind: input, shape index: {}]   ;;  %s2861_s4 = inlined_call_operand.vmem [shape: f32[16,10], index: 4, kind: input, shape index: {}]   ;;  %s2862_s5 = inlined_call_operand.vmem [shape: f32[1,10], index: 5, kind: input, shape index: {}]   ;;  %s2863_s6 = inlined_call_operand.hbm [shape: f32[2,1,10], index: 6, kind: output, shape index: {}]  }
   0x1   :  { %13 = vsyncpa [#allocation3 + $0x1], 0  ;;  %s2554_s21 = smov 0   ;;  %s2556_s22 = smov 0  }
   0x2   :  { %s2558_s23 = smov 0   ;;  %s2560_s24 = smov 0  }
   0x3 LB: > { %s2575_s25 = sadd.s32 4294967295, %s2505_s24   ;;  %s2208_s26 = sadd.s32 4294967294, %s2505_s24   ;;  %s2505_s24 = sphi %s2560_s24, %s2869_s24   ;;  %s2501_s23 = sphi %s2558_s23, %s2868_s23   ;;  %s2497_s22 = sphi %s2556_s22, %s2867_s22   ;;  %s2493_s21 = sphi %s2554_s21, %s2866_s21  }
   0x4   : > { %s2579_s27 = sadd.s32 1, %s2505_s24   ;;  %s157_s28 = sadd.s32 1, %s2501_s23 }
   0x5   : > { %s154_s29 = ssub.s32 %s2505_s24, %s2579_s27  ;;  %p167_p0 = scmp.ne.s32.totalorder %s2501_s23, %s2497_s22 }
   0x6   : > { %p155_p1 = scmp.eq.s32.totalorder %s154_s29, 0  ;;  %p168_p2 = scmp.eq.s32.totalorder %s2575_s25, 1 }
   0x7   : > { %p173_p3 = scmp.ne.s32.totalorder %s2497_s22, %s2493_s21  ;;  %p174_p4 = scmp.eq.s32.totalorder %s2208_s26, 1 }
   0x8   : > { %s2590_s30 = scalar_select %p155_p1, %s2501_s23, %s157_s28  }
   0x9   : > { %p2592_p5 = por %p168_p2, %p167_p0  ;;  %p2596_p6 = por %p174_p4, %p173_p3 }
   0xa   : > { %p2211_p7 = scmp.ge.s32.totalorder %s2505_s24, 1  ;;  %p215_p8 = scmp.lt.s32.totalorder %s2505_s24, 3 }
   0xc   : > { %p216_p9 = pnand %p2211_p7, %p215_p8 }
   0xd   : > { %p244_p10 = scmp.lt.s32.totalorder (!%p216_p9), %s2575_s25, 1  ;;  %s2508_s16 = smov (!%p216_p9), 127  }
   0xe   : > { %219 = sbr.rel (%p216_p9) target bundleno = 813 (0x32d), region = 44  ;;  %s2509_s17 = smov (!%p216_p9), 126  }
   0xf   : > { %s2510_s18 = smov (!%p216_p9), 110   ;;  %s2511_s19 = smov (!%p216_p9), 109  }
  0x10   : > { %s2512_s20 = smov (!%p216_p9), 108   ;;  %s2513_s26 = smov (!%p216_p9), 92  }
  0x11   : > { %s2514_s28 = smov (!%p216_p9), 91   ;;  %s2515_s29 = smov (!%p216_p9), 90  }
  0x13   : > { %v2606_v0 = vld [vmem:[%s2859_s2 + $0x10] sm:$0xff]  ;;  %vm268_vm0 = vcmask 23552   ;;  %s245_s11 = scalar_select %p244_p10, %s2575_s25, 1  ;;  %v2507_v1 = vmov 0.0   ;;  %v1873_v5 = vld [vmem:[%s2860_s3 + $0x8] sm:$0xff]  ;;  %v1872_v6 = vld [vmem:[%s2860_s3] sm:$0xff] }
  0x14   : > { %2334 = vmatprep.mubr.msk.f32.mxu1 %vm268_vm0, %v2606_v0  ;;  %346 = vmatprep.mubr.f32.mxu0 %v2507_v1  ;;  %v2516_v7 = vmov 0   ;;  %vm275_vm1 = vcmask 1042432   ;;  %vm265_vm2 = vcmask 1039360   ;;  %v2214_v12 = vld [vmem:[%s2859_s2 + $0x18] sm:$0xff]  ;;  %vm607_vm3 = vcmask 1031168   ;;  %v251_v16 = vld [vmem:[%s2859_s2] sm:$0xff] }
  0x15   : > { %s2391_s12 = smul.u32 12, %s245_s11  ;;  %2442 = vset.pattern.permute.xlu0 %v2516_v7  ;;  %2443 = vset.pattern.permute.xlu1 %v2516_v7  ;;  %vm789_vm4 = vcmask 900096   ;;  %v252_v20 = vld [vmem:[%s2859_s2 + $0x8] sm:$0xff]  ;;  %v2229_v22 = vld [vmem:[%s2859_s2 + $0x20] sm:$0xff]  ;;  %vm971_vm5 = vcmask 891904   ;;  %v2238_v30 = vld [vmem:[%s2859_s2 + $0x30] sm:$0xff] }
  0x16   : > { %v2230_v26 = vld [vmem:[%s2859_s2 + $0x28] sm:$0xff]  ;;  %vm1153_vm6 = vcmask 883712   ;;  %v2239_v34 = vld [vmem:[%s2859_s2 + $0x38] sm:$0xff]  ;;  %v2247_v36 = vld [vmem:[%s2859_s2 + $0x40] sm:$0xff]  ;;  %vm1335_vm7 = vcmask 752640   ;;  %vm1517_vm8 = vcmask 744448  }
  0x17   : > { %s248_s15 = scalar_lea.vmem %s2857_s0, %s2391_s12  ;;  %v2248_v40 = vld [vmem:[%s2859_s2 + $0x48] sm:$0xff]  ;;  %v2256_v44 = vld [vmem:[%s2859_s2 + $0x50] sm:$0xff]  ;;  %v2257_v48 = vld [vmem:[%s2859_s2 + $0x58] sm:$0xff]  ;;  %vm1699_vm9 = vcmask 736256   ;;  %vm2517_vm10 = vmmov 0   ;;  %vm1912_vm11 = vcmask 244736  }
  0x18   : > { %v2615_v2 = vld [vmem:[%s248_s15] sm:$0x77]  ;;  %v250_v4 = vld [vmem:[%s248_s15 + $0x8] sm:$0x7]  ;;  %v2274_v57 = vld [vmem:[%s2859_s2 + $0x70] sm:$0xff]  ;;  %vm2064_vm12 = vcmask 130048  }
  0x19   : > { %259 = vrot.lane.b32.xlu1 %v2615_v2, %s2508_s16  ;;  %v258_v3 = vcombine.high %v2615_v2, %v2615_v2  ;;  %v2265_v50 = vld [vmem:[%s2859_s2 + $0x60] sm:$0xff]  ;;  %v2266_v53 = vld [vmem:[%s2859_s2 + $0x68] sm:$0xff]  ;;  %v2275_v61 = vld [vmem:[%s2859_s2 + $0x78] sm:$0xff]  ;;  %s2296_s11 = sshll.u32 %s2575_s25, 4  ;;  %vm2138_vm13 = vcmask 73728   ;;  %s2518_s25 = smov [#allocation2]  }
  0x1a   : > { %v2283_v62 = vld [vmem:[%s2859_s2 + $0x80] sm:$0xff] }
  0x1b   : > { %261 = vrot.lane.b32.xlu0 %v258_v3, %s2508_s16 }
  0x1d   : > { %603 = vrot.lane.b32.xlu1 %v258_v3, %s2509_s17 }
  0x1f   : > { %263 = vrot.lane.b32.xlu0 %v250_v4, %s2508_s16  ;;  %s2822_s16 = scalar_lea.hbm %s2863_s6, %s2296_s11 }
  0x21   : > { %601 = vrot.lane.b32.xlu1 %v2615_v2, %s2509_s17 }
  0x23   : > { %605 = vrot.lane.b32.xlu0 %v250_v4, %s2509_s17 }
  0x25   : > { %785 = vrot.lane.b32.xlu1 %v258_v3, %s2510_s18 }
  0x27   : > { %787 = vrot.lane.b32.xlu0 %v250_v4, %s2510_s18 }
  0x29   : > { %967 = vrot.lane.b32.xlu1 %v258_v3, %s2511_s19 }
  0x2b   : > { %783 = vrot.lane.b32.xlu0 %v2615_v2, %s2510_s18 }
  0x2d   : > { %965 = vrot.lane.b32.xlu1 %v2615_v2, %s2511_s19 }
  0x2f   : > { %969 = vrot.lane.b32.xlu0 %v250_v4, %s2511_s19  ;;  %s2449_s19 = sshll.u32 %s2518_s25, 4  ;;  %s2450_s19 = int_to_ptr.vmem [resolvable:$false] %s2449_s19 }
  0x31   : > { %1149 = vrot.lane.b32.xlu1 %v258_v3, %s2512_s20 }
  0x33   : > { %1151 = vrot.lane.b32.xlu0 %v250_v4, %s2512_s20 }
  0x35   : > { %1331 = vrot.lane.b32.xlu1 %v258_v3, %s2513_s26 }
  0x37   : > { %1147 = vrot.lane.b32.xlu0 %v2615_v2, %s2512_s20  ;;  %s2451_s20 = scalar_lea.vmem %s2450_s19, 32 }
  0x39   : > { %1329 = vrot.lane.b32.xlu1 %v2615_v2, %s2513_s26 }
  0x3b   : > { %1333 = vrot.lane.b32.xlu0 %v250_v4, %s2513_s26 }
  0x3d   : > { %1513 = vrot.lane.b32.xlu1 %v258_v3, %s2514_s28 }
  0x3f   : > { %1515 = vrot.lane.b32.xlu0 %v250_v4, %s2514_s28 }
  0x41   : > { %1695 = vrot.lane.b32.xlu1 %v258_v3, %s2515_s29 }
  0x43   : > { %1511 = vrot.lane.b32.xlu0 %v2615_v2, %s2514_s28 }
  0x45   : > { %1693 = vrot.lane.b32.xlu1 %v2615_v2, %s2515_s29 }
  0x47   : > { %1697 = vrot.lane.b32.xlu0 %v250_v4, %s2515_s29  ;;  %s242_s29 = sand.u32 1, %s2497_s22  }
  0x48   : > { %s243_s12 = scalar_lea.vmem [#allocation2], %s242_s29  ;;  %s2141_s17 = scalar_lea.sflag [#allocation3], %s242_s29 }
  0x49   : > { %1876 = vperm.xlu1 %2443, %v1872_v6   ;;  %s2153_s13 = sshll.u32 %s243_s12, 4  ;;  %s2154_s13 = int_to_ptr.vmem [resolvable:$true] %s2153_s13 }
  0x4a   : > { %s2445_s18 = scalar_lea.vmem %s2154_s13, 16  ;;  %p2452_p0 = scmp.lt.s32.totalorder %s2154_s13, %s2450_s19 }
  0x4b   : > { %1881 = vperm.xlu0 %2442, %v1873_v5   ;;  %v1896_v5 = vld [vmem:[%s2858_s1] sm:$0x7]  ;;  %p2446_p11 = scmp.ne.s32.totalorder %s2154_s13, %s2445_s18  ;;  %p2453_p1 = scmp.lt.s32.totalorder %s2451_s20, %s2445_s18 }
  0x4d   : > { %p2447_p12 = pnand %p2446_p11, %p2592_p5  ;;  %p2454_p2 = por %p2453_p1, %p2452_p0 }
  0x4f   : > { %p2448_p13 = pneg %p2447_p12 }
  0x51   : > { %p2455_p3 = pnand %p2454_p2, %p2448_p13 }
  0x8b   : > { %v260_v8 = vpop.permute.xlu1 %259 }
  0x8d   : > { %v262_v9 = vpop.permute.xlu0 %261 }
  0x8e   : > { %v266_v14 = vsel %vm265_vm2, %v260_v8, %v262_v9 }
  0x8f   : > { %v604_v10 = vpop.permute.xlu1 %603 }
  0x91   : > { %v264_v11 = vpop.permute.xlu0 %263 }
  0x92   : > { %2332 = vmatprep.subr.msk.mxu1 %vm275_vm1, %v264_v11  ;;  %v267_v13 = vsel %vm265_vm2, %v262_v9, %v264_v11 }
  0x93   : > { %2215 = vmatprep.subr.msk.mxu0 %vm275_vm1, %v267_v13  ;;  %2333 = vmatpush3.msk.msra.mxu1 %vm275_vm1, %v264_v11  ;;  %v602_v15 = vpop.permute.xlu1 %601 }
  0x94   : > { %2216 = vmatpush1.msk.msra.mxu0 %vm275_vm1, %v266_v14  ;;  %2335 = vmatmul.mubr.msk.f32.vlgmr.msra.gmra.mxu1 %vm268_vm0, %v2214_v12  ;;  %v608_v24 = vsel %vm607_vm3, %v602_v15, %v604_v10 }
  0x95   : > { %2217 = vmatmul.mubr.msk.f32.vlgmr.msra.gmra.mxu0 %vm268_vm0, %v2606_v0  ;;  %2337 = vmatprep.subr.msk.mxu0 %vm275_vm1, %v250_v4  ;;  %v606_v17 = vpop.permute.xlu0 %605  ;;  %v2284_v0 = vld [vmem:[%s2859_s2 + $0x88] sm:$0xff] }
  0x96   : > { %2222 = vmatprep.subr.msk.mxu1 %vm275_vm1, %v258_v3  ;;  %2338 = vmatpush3.msk.msra.mxu0 %vm275_vm1, %v250_v4  ;;  %v609_v18 = vsel %vm607_vm3, %v604_v10, %v606_v17 }
  0x97   : > { %2223 = vmatpush1.msk.msra.mxu1 %vm275_vm1, %v2615_v2  ;;  %510 = vmatprep.mubr.f32.mxu1 %v2507_v1  ;;  %v786_v19 = vpop.permute.xlu1 %785  ;;  %v1898_v2 = vlaneseq }
  0x98   : > { %352 = vmatprep.mubr.f32.mxu0 %v2507_v1  ;;  %2224 = vmatmul.mubr.msk.f32.vlgmr.msra.gmra.mxu1 %vm268_vm0, %v251_v16 }
  0x99   : > { %2218 = vmatmul.mubr.msk.f32.gmra.mxu0 %vm268_vm0, %v2214_v12  ;;  %2231 = vmatprep.subr.msk.mxu0 %vm275_vm1, %v609_v18  ;;  %v788_v21 = vpop.permute.xlu0 %787  ;;  %v1899_v3 = vshrl.u32 %v1898_v2, 7 }
  0x9a   : > { %516 = vmatprep.mubr.f32.mxu1 %v2507_v1  ;;  %2342 = vmatprep.subr.msk.mxu1 %vm275_vm1, %v606_v17  ;;  %v791_v23 = vsel %vm789_vm4, %v786_v19, %v788_v21 }
  0x9b   : > { %2339 = vmatprep.mubr.msk.f32.mxu0 %vm268_vm0, %v251_v16  ;;  %2343 = vmatpush3.msk.msra.mxu1 %vm275_vm1, %v606_v17  ;;  %v968_v25 = vpop.permute.xlu1 %967  ;;  %v1908_v4 = vsub.s32 2, %v1899_v3  ;;  %v1904_v6 = vsub.s32 1, %v1899_v3  ;;  %v1900_v7 = vsub.s32 0, %v1899_v3 }
  0x9c   : > { %2225 = vmatmul.mubr.msk.f32.gmra.mxu1 %vm268_vm0, %v252_v20  ;;  %2240 = vmatprep.subr.msk.mxu1 %vm275_vm1, %v791_v23 }
  0x9d   : > { %2340 = vmatmul.mubr.msk.f32.vlgmr.msra.gmra.mxu0 %vm268_vm0, %v252_v20  ;;  %2344 = vmatprep.mubr.msk.f32.mxu1 %vm268_vm0, %v2229_v22  ;;  %v784_v27 = vpop.permute.xlu0 %783  ;;  %v2792_v8 = vrot.slane %v1896_v5, %v1908_v4  ;;  %v1905_v9 = vrot.slane %v1896_v5, %v1904_v6  ;;  %v2796_v10 = vrot.slane %v1896_v5, %v1900_v7 }
  0x9e   : > { %2232 = vmatpush1.msk.msra.mxu0 %vm275_vm1, %v608_v24  ;;  %686 = vmatprep.mubr.f32.mxu0 %v2507_v1  ;;  %v790_v28 = vsel %vm789_vm4, %v784_v27, %v786_v19 }
  0x9f   : > { %2347 = vmatprep.subr.msk.mxu0 %vm275_vm1, %v788_v21  ;;  %v966_v29 = vpop.permute.xlu1 %965 }
  0xa0   : > { %2345 = vmatmul.mubr.msk.f32.vlgmr.msra.gmra.mxu1 %vm268_vm0, %v2230_v26  ;;  %v972_v38 = vsel %vm971_vm5, %v966_v29, %v968_v25 }
  0xa1   : > { %2233 = vmatmul.mubr.msk.f32.vlgmr.msra.gmra.mxu0 %vm268_vm0, %v2229_v22  ;;  %2241 = vmatpush1.msk.msra.mxu1 %vm275_vm1, %v790_v28  ;;  %v970_v31 = vpop.permute.xlu0 %969 }
  0xa2   : > { %2348 = vmatpush3.msk.msra.mxu0 %vm275_vm1, %v788_v21  ;;  %868 = vmatprep.mubr.f32.mxu1 %v2507_v1  ;;  %v973_v32 = vsel %vm971_vm5, %v968_v25, %v970_v31 }
  0xa3   : > { %692 = vmatprep.mubr.f32.mxu0 %v2507_v1  ;;  %2249 = vmatprep.subr.msk.mxu0 %vm275_vm1, %v973_v32  ;;  %v1150_v33 = vpop.permute.xlu1 %1149 }
  0xa4   : > { %2242 = vmatmul.mubr.msk.f32.vlgmr.msra.gmra.mxu1 %vm268_vm0, %v2238_v30  ;;  %2352 = vmatprep.subr.msk.mxu1 %vm275_vm1, %v970_v31 }
  0xa5   : > { %2234 = vmatmul.mubr.msk.f32.gmra.mxu0 %vm268_vm0, %v2230_v26  ;;  %874 = vmatprep.mubr.f32.mxu1 %v2507_v1  ;;  %v1152_v35 = vpop.permute.xlu0 %1151 }
  0xa6   : > { %2349 = vmatprep.mubr.msk.f32.mxu0 %vm268_vm0, %v2238_v30  ;;  %2353 = vmatpush3.msk.msra.mxu1 %vm275_vm1, %v970_v31  ;;  %v1155_v37 = vsel %vm1153_vm6, %v1150_v33, %v1152_v35 }
  0xa7   : > { %v1332_v39 = vpop.permute.xlu1 %1331  ;;  %2258 = vmatprep.subr.msk.mxu1 %vm275_vm1, %v1155_v37 }
  0xa8   : > { %2243 = vmatmul.mubr.msk.f32.gmra.mxu1 %vm268_vm0, %v2239_v34 }
  0xa9   : > { %2350 = vmatmul.mubr.msk.f32.vlgmr.msra.gmra.mxu0 %vm268_vm0, %v2239_v34  ;;  %2354 = vmatprep.mubr.msk.f32.mxu1 %vm268_vm0, %v2247_v36  ;;  %v1148_v41 = vpop.permute.xlu0 %1147 }
  0xaa   : > { %2250 = vmatpush1.msk.msra.mxu0 %vm275_vm1, %v972_v38  ;;  %1050 = vmatprep.mubr.f32.mxu0 %v2507_v1  ;;  %v1154_v42 = vsel %vm1153_vm6, %v1148_v41, %v1150_v33 }
  0xab   : > { %2357 = vmatprep.subr.msk.mxu0 %vm275_vm1, %v1152_v35  ;;  %v1330_v43 = vpop.permute.xlu1 %1329 }
  0xac   : > { %2355 = vmatmul.mubr.msk.f32.vlgmr.msra.gmra.mxu1 %vm268_vm0, %v2248_v40  ;;  %v1336_v52 = vsel %vm1335_vm7, %v1330_v43, %v1332_v39 }
  0xad   : > { %2251 = vmatmul.mubr.msk.f32.vlgmr.msra.gmra.mxu0 %vm268_vm0, %v2247_v36  ;;  %2259 = vmatpush1.msk.msra.mxu1 %vm275_vm1, %v1154_v42  ;;  %v1334_v45 = vpop.permute.xlu0 %1333 }
  0xae   : > { %2358 = vmatpush3.msk.msra.mxu0 %vm275_vm1, %v1152_v35  ;;  %1232 = vmatprep.mubr.f32.mxu1 %v2507_v1  ;;  %v1337_v46 = vsel %vm1335_vm7, %v1332_v39, %v1334_v45 }
  0xaf   : > { %1056 = vmatprep.mubr.f32.mxu0 %v2507_v1  ;;  %2267 = vmatprep.subr.msk.mxu0 %vm275_vm1, %v1337_v46  ;;  %v1514_v47 = vpop.permute.xlu1 %1513 }
  0xb0   : > { %2260 = vmatmul.mubr.msk.f32.vlgmr.msra.gmra.mxu1 %vm268_vm0, %v2256_v44  ;;  %2362 = vmatprep.subr.msk.mxu1 %vm275_vm1, %v1334_v45 }
  0xb1   : > { %2252 = vmatmul.mubr.msk.f32.gmra.mxu0 %vm268_vm0, %v2248_v40  ;;  %1238 = vmatprep.mubr.f32.mxu1 %v2507_v1  ;;  %v1516_v49 = vpop.permute.xlu0 %1515 }
  0xb2   : > { %2359 = vmatprep.mubr.msk.f32.mxu0 %vm268_vm0, %v2256_v44  ;;  %2363 = vmatpush3.msk.msra.mxu1 %vm275_vm1, %v1334_v45  ;;  %v1519_v51 = vsel %vm1517_vm8, %v1514_v47, %v1516_v49 }
  0xb3   : > { %2276 = vmatprep.subr.msk.mxu1 %vm275_vm1, %v1519_v51  ;;  %v1696_v55 = vpop.permute.xlu1 %1695 }
  0xb4   : > { %2261 = vmatmul.mubr.msk.f32.gmra.mxu1 %vm268_vm0, %v2257_v48 }
  0xb5   : > { %2360 = vmatmul.mubr.msk.f32.vlgmr.msra.gmra.mxu0 %vm268_vm0, %v2257_v48  ;;  %2364 = vmatprep.mubr.msk.f32.mxu1 %vm268_vm0, %v2265_v50  ;;  %v1512_v54 = vpop.permute.xlu0 %1511 }
  0xb6   : > { %2268 = vmatpush1.msk.msra.mxu0 %vm275_vm1, %v1336_v52  ;;  %1414 = vmatprep.mubr.f32.mxu0 %v2507_v1  ;;  %v1518_v56 = vsel %vm1517_vm8, %v1512_v54, %v1514_v47 }
  0xb7   : > { %2367 = vmatprep.subr.msk.mxu0 %vm275_vm1, %v1516_v49  ;;  %v1694_v60 = vpop.permute.xlu1 %1693 }
  0xb8   : > { %2365 = vmatmul.mubr.msk.f32.vlgmr.msra.gmra.mxu1 %vm268_vm0, %v2266_v53  ;;  %v1700_v63 = vsel %vm1699_vm9, %v1694_v60, %v1696_v55 }
  0xb9   : > { %2269 = vmatmul.mubr.msk.f32.vlgmr.msra.gmra.mxu0 %vm268_vm0, %v2265_v50  ;;  %2277 = vmatpush1.msk.msra.mxu1 %vm275_vm1, %v1518_v56  ;;  %v1698_v58 = vpop.permute.xlu0 %1697 }
  0xba   : > { %2368 = vmatpush3.msk.msra.mxu0 %vm275_vm1, %v1516_v49  ;;  %1596 = vmatprep.mubr.f32.mxu1 %v2507_v1  ;;  %v1701_v59 = vsel %vm1699_vm9, %v1696_v55, %v1698_v58 }
  0xbb   : > { %1420 = vmatprep.mubr.f32.mxu0 %v2507_v1  ;;  %2285 = vmatprep.subr.msk.mxu0 %vm275_vm1, %v1701_v59 }
  0xbc   : > { %2278 = vmatmul.mubr.msk.f32.vlgmr.msra.gmra.mxu1 %vm268_vm0, %v2274_v57  ;;  %2372 = vmatprep.subr.msk.mxu1 %vm275_vm1, %v1698_v58 }
  0xbd   : > { %2270 = vmatmul.mubr.msk.f32.gmra.mxu0 %vm268_vm0, %v2266_v53  ;;  %1602 = vmatprep.mubr.f32.mxu1 %v2507_v1 }
  0xbe   : > { %2369 = vmatprep.mubr.msk.f32.mxu0 %vm268_vm0, %v2274_v57  ;;  %2373 = vmatpush3.msk.msra.mxu1 %vm275_vm1, %v1698_v58 }
  0xbf   : > { %2377 = vmatprep.subr.mxu1 %v2507_v1 }
  0xc0   : > { %2279 = vmatmul.mubr.msk.f32.gmra.mxu1 %vm268_vm0, %v2275_v61 }
  0xc1   : > { %2370 = vmatmul.mubr.msk.f32.vlgmr.msra.gmra.mxu0 %vm268_vm0, %v2275_v61  ;;  %2374 = vmatprep.mubr.msk.f32.mxu1 %vm268_vm0, %v2283_v62 }
  0xc2   : > { %2286 = vmatpush1.msk.msra.mxu0 %vm275_vm1, %v1700_v63  ;;  %1778 = vmatprep.mubr.f32.mxu0 %v2507_v1 }
  0xc4   : > { %2375 = vmatmul.mubr.msk.f32.vlgmr.msra.gmra.mxu1 %vm268_vm0, %v2284_v0 }
  0xc5   : > { %2287 = vmatmul.mubr.msk.f32.vlgmr.msra.gmra.mxu0 %vm268_vm0, %v2283_v62  ;;  %2381 = vmatprep.mubr.msk.f32.mxu1 %vm2517_vm10, %v2507_v1 }
  0xc6   : > { %1784 = vmatprep.mubr.f32.mxu0 %v2507_v1 }
  0xc9   : > { %2288 = vmatmul.mubr.msk.f32.gmra.mxu0 %vm268_vm0, %v2284_v0 }
  0xca   : > { %1985 = vmatprep.mubr.f32.mxu0 %v1905_v9 }
 0x154   : > { %v2336_v11 = vpop.f32.mrf.mxu1 }
 0x155   : > { %v348_v12 = vpop.f32.mrf.mxu0 }
 0x156   : > { %v425_v13 = vpop.f32.mrf.mxu1 }
 0x157   : > { %v350_v14 = vpop.f32.mrf.mxu0 }
 0x158   : > { %v512_v15 = vpop.f32.mrf.mxu1 }
 0x159   : > { %v354_v16 = vpop.f32.mrf.mxu0  ;;  %v513_v59 = vadd.f32 %v512_v15, %v348_v12 }
 0x15a   : > { %v514_v17 = vpop.f32.mrf.mxu1 }
 0x15b   : > { %v356_v18 = vpop.f32.mrf.mxu0  ;;  %v515_v48 = vadd.f32 %v514_v17, %v350_v14 }
 0x15c   : > { %v518_v19 = vpop.f32.mrf.mxu1 }
 0x15d   : > { %v2341_v20 = vpop.f32.mrf.mxu0  ;;  %v519_v49 = vadd.f32 %v518_v19, %v354_v16 }
 0x15e   : > { %v520_v21 = vpop.f32.mrf.mxu1  ;;  %v595_v39 = vadd.f32 %v2341_v20, %v2336_v11 }
 0x15f   : > { %v589_v22 = vpop.f32.mrf.mxu0  ;;  %v521_v54 = vadd.f32 %v520_v21, %v356_v18 }
 0x160   : > { %v2346_v23 = vpop.f32.mrf.mxu1  ;;  %v590_v42 = vadd.f32 %v589_v22, %v425_v13 }
 0x161   : > { %v688_v24 = vpop.f32.mrf.mxu0  ;;  %v779_v45 = vadd.f32 %v2346_v23, %v595_v39 }
 0x162   : > { %v765_v25 = vpop.f32.mrf.mxu1  ;;  %v774_v0 = vadd.f32 %v688_v24, %v513_v59 }
 0x163   : > { %v690_v26 = vpop.f32.mrf.mxu0  ;;  %v776_v50 = vadd.f32 %v765_v25, %v590_v42  ;;  %v1877_v42 = vpop.permute.xlu1 %1876 }
 0x164   : > { %v870_v27 = vpop.f32.mrf.mxu1  ;;  %v775_v55 = vadd.f32 %v690_v26, %v515_v48 }
 0x165   : > { %v694_v28 = vpop.f32.mrf.mxu0  ;;  %v956_v18 = vadd.f32 %v870_v27, %v774_v0 }
 0x166   : > { %v872_v29 = vpop.f32.mrf.mxu1  ;;  %v777_v56 = vadd.f32 %v694_v28, %v519_v49 }
 0x167   : > { %v696_v30 = vpop.f32.mrf.mxu0  ;;  %v957_v3 = vadd.f32 %v872_v29, %v775_v55 }
 0x168   : > { %v876_v31 = vpop.f32.mrf.mxu1  ;;  %v778_v61 = vadd.f32 %v696_v30, %v521_v54 }
 0x169   : > { %v2351_v32 = vpop.f32.mrf.mxu0  ;;  %v959_v4 = vadd.f32 %v876_v31, %v777_v56 }
 0x16a   : > { %v878_v33 = vpop.f32.mrf.mxu1  ;;  %v961_v51 = vadd.f32 %v2351_v32, %v779_v45 }
 0x16b   : > { %v947_v34 = vpop.f32.mrf.mxu0  ;;  %v960_v11 = vadd.f32 %v878_v33, %v778_v61 }
 0x16c   : > { %v2356_v35 = vpop.f32.mrf.mxu1  ;;  %v958_v57 = vadd.f32 %v947_v34, %v776_v50 }
 0x16d   : > { %v1052_v36 = vpop.f32.mrf.mxu0  ;;  %v1143_v62 = vadd.f32 %v2356_v35, %v961_v51  ;;  %v1882_v35 = vpop.permute.xlu0 %1881 }
 0x16e   : > { %v1129_v37 = vpop.f32.mrf.mxu1  ;;  %v1138_v21 = vadd.f32 %v1052_v36, %v956_v18 }
 0x16f   : > { %v1054_v38 = vpop.f32.mrf.mxu0  ;;  %v1140_v5 = vadd.f32 %v1129_v37, %v958_v57 }
 0x170   : > { %v1234_v40 = vpop.f32.mrf.mxu1  ;;  %v1139_v13 = vadd.f32 %v1054_v38, %v957_v3  ;;  %v2062_v3 = vld [vmem:[%s2861_s4 + $0x8] sm:$0xff] }
 0x171   : > { %v1058_v41 = vpop.f32.mrf.mxu0  ;;  %v1320_v37 = vadd.f32 %v1234_v40, %v1138_v21 }
 0x172   : > { %v1236_v43 = vpop.f32.mrf.mxu1  ;;  %v1141_v14 = vadd.f32 %v1058_v41, %v959_v4 }
 0x173   : > { %v1060_v44 = vpop.f32.mrf.mxu0  ;;  %v1321_v23 = vadd.f32 %v1236_v43, %v1139_v13 }
 0x174   : > { %v1240_v46 = vpop.f32.mrf.mxu1  ;;  %v1142_v12 = vadd.f32 %v1060_v44, %v960_v11 }
 0x175   : > { %v2361_v47 = vpop.f32.mrf.mxu0  ;;  %v1323_v24 = vadd.f32 %v1240_v46, %v1141_v14 }
 0x176   : > { %v1242_v52 = vpop.f32.mrf.mxu1  ;;  %v1325_v6 = vadd.f32 %v2361_v47, %v1143_v62 }
 0x177   : > { %v1311_v53 = vpop.f32.mrf.mxu0  ;;  %v1324_v30 = vadd.f32 %v1242_v52, %v1142_v12 }
 0x178   : > { %v2366_v58 = vpop.f32.mrf.mxu1  ;;  %v1322_v16 = vadd.f32 %v1311_v53, %v1140_v5 }
 0x179   : > { %v1416_v60 = vpop.f32.mrf.mxu0  ;;  %v1507_v15 = vadd.f32 %v2366_v58, %v1325_v6 }
 0x17a   : > { %v1493_v63 = vpop.f32.mrf.mxu1  ;;  %v1502_v36 = vadd.f32 %v1416_v60, %v1320_v37 }
 0x17b   : > { %v1418_v2 = vpop.f32.mrf.mxu0  ;;  %v1504_v25 = vadd.f32 %v1493_v63, %v1322_v16 }
 0x17c   : > { %v1598_v7 = vpop.f32.mrf.mxu1  ;;  %v1503_v31 = vadd.f32 %v1418_v2, %v1321_v23 }
 0x17d   : > { %v1422_v9 = vpop.f32.mrf.mxu0  ;;  %v1684_v54 = vadd.f32 %v1598_v7, %v1502_v36 }
 0x17e   : > { %v1600_v17 = vpop.f32.mrf.mxu1  ;;  %v1505_v32 = vadd.f32 %v1422_v9, %v1323_v24  ;;  %v2063_v9 = vld [vmem:[%s2862_s5] sm:$0x1] }
 0x17f   : > { %v1424_v19 = vpop.f32.mrf.mxu0  ;;  %v1685_v46 = vadd.f32 %v1600_v17, %v1503_v31 }
 0x180   : > { %v1604_v20 = vpop.f32.mrf.mxu1  ;;  %v1506_v39 = vadd.f32 %v1424_v19, %v1324_v30 }
 0x181   : > { %v2371_v22 = vpop.f32.mrf.mxu0  ;;  %v1687_v47 = vadd.f32 %v1604_v20, %v1505_v32 }
 0x182   : > { %v1689_v26 = vadd.f32 %v2371_v22, %v1507_v15  ;;  %v1606_v28 = vpop.f32.mrf.mxu1 }
 0x183   : > { %v1675_v29 = vpop.f32.mrf.mxu0  ;;  %v1688_v51 = vadd.f32 %v1606_v28, %v1506_v39 }
 0x184   : > { %v1686_v33 = vadd.f32 %v1675_v29, %v1504_v25  ;;  %v2376_v34 = vpop.f32.mrf.mxu1 }
 0x185   : > { %v1871_v27 = vadd.f32 %v2376_v34, %v1689_v26  ;;  %v1780_v38 = vpop.f32.mrf.mxu0 }
 0x186   : > { %v1857_v41 = vpop.f32.mrf.mxu1  ;;  %v1866_v56 = vadd.f32 %v1780_v38, %v1684_v54 }
 0x187   : > { %v1868_v44 = vadd.f32 %v1857_v41, %v1686_v33  ;;  %v1889_v43 = vadd.f32 %v1882_v35, %v1871_v27  ;;  %v1782_v45 = vpop.f32.mrf.mxu0 }
 0x188   : > { %v1867_v52 = vadd.f32 %v1782_v45, %v1685_v46  ;;  %v1884_v62 = vadd.f32 %v1877_v42, %v1866_v56 }
 0x189   : > { %v1895_v48 = vmax.f32 %v1889_v43, 0.0  ;;  %v1886_v49 = vadd.f32 %v1877_v42, %v1868_v44  ;;  %v1786_v50 = vpop.f32.mrf.mxu0 }
 0x18a   : > { %v1869_v53 = vadd.f32 %v1786_v50, %v1687_v47  ;;  %v1885_v59 = vadd.f32 %v1877_v42, %v1867_v52  ;;  %v1890_v2 = vmax.f32 %v1884_v62, 0.0 }
 0x18b   : > { %v1788_v40 = vpop.f32.mrf.mxu0  ;;  %2378 = vmatpush3.xpose.msk.msra.mxu1 %vm1912_vm11, %v1895_v48  ;;  %v1892_v57 = vmax.f32 %v1886_v49, 0.0 }
 0x18c   : > { %v1870_v55 = vadd.f32 %v1788_v40, %v1688_v51  ;;  %2379 = vmatprep.subr.mxu1 %v2507_v1  ;;  %v1887_v58 = vadd.f32 %v1882_v35, %v1869_v53  ;;  %v1891_v0 = vmax.f32 %v1885_v59, 0.0 }
 0x18e   : > { %v1888_v60 = vadd.f32 %v1882_v35, %v1870_v55  ;;  %v1893_v63 = vmax.f32 %v1887_v58, 0.0 }
 0x18f   : > { %2380 = vmatpush3.xpose.msk.msra.mxu1 %vm1912_vm11, %v1892_v57 }
 0x190   : > { %v1894_v61 = vmax.f32 %v1888_v60, 0.0 }
 0x192   : > { %1949 = vmatprep.subr.mxu0 %v1894_v61  ;;  %2382 = vmatmul.mubr.msk.f32.vlgmr.msra.gmra.mxu1 %vm1912_vm11, %v2792_v8  ;;  %v2061_v8 = vld [vmem:[%s2861_s4] sm:$0xff] }
 0x193   : > { %1950 = vmatpush1.xpose.msra.mxu0 %v1893_v63 }
 0x194   : > { %1951 = vmatprep.subr.mxu0 %v1891_v0 }
 0x197   : > { %1952 = vmatpush1.xpose.msra.mxu0 %v1890_v2 }
 0x198   : > { %2384 = vmatprep.subr.mxu0 %v2507_v1 }
 0x19a   : > { %1986 = vmatmul.mubr.f32.vlgmr.msra.gmra.mxu0 %v2796_v10 }
 0x19b   : > { %2388 = vmatprep.mubr.msk.f32.mxu0 %vm2517_vm10, %v2507_v1  ;;  %2385 = vmatpush3.msra.mxu0 %v2062_v3 }
 0x19c   : > { %2386 = vmatprep.subr.mxu0 %v2507_v1 }
 0x19d   : > { %2387 = vmatpush3.msra.mxu0 %v2061_v8 }
 0x252   : > { %v2057_v4 = vpop.f32.mrf.mxu1 }
 0x254   : > { %v2383_v5 = vpop.f32.mrf.mxu1 }
 0x25a   : > { %v1987_v6 = vpop.f32.mrf.mxu0 }
 0x25b   : > { %v2058_v10 = vadd.f32 %v2057_v4, %v1987_v6 }
 0x25c   : > { %v1989_v7 = vpop.f32.mrf.mxu0 }
 0x25d   : > { %2389 = vmatmul.mubr.msk.f32.vlgmr.msra.gmra.mxu0 %vm2064_vm12, %v2058_v10 }
 0x31d   : > { %v2134_v1 = vpop.f32.mrf.mxu0 }
 0x31e   : > { %v2135_v11 = vadd.f32 %v2134_v1, %v2063_v9 }
 0x31f   : > { %v2390_v13 = vpop.f32.mrf.mxu0 }
 0x320   : > { %2139 = vst.msk [vmem:[%s243_s12] sm:$0x1] %vm2138_vm13, %v2135_v11 }
 0x321   : > { %2458 = shalt.err (!%p2455_p3)
}
 0x322   : > { %s2459_s26 = scalar_lea.hbm %s2822_s16, 16  ;;  %s2463_s9 = scalar_lea.hbm %s2863_s6, 32 }
 0x323   : > { %p2460_p4 = scmp.ne.s32.totalorder %s2822_s16, %s2459_s26  ;;  %p2464_p9 = scmp.lt.s32.totalorder %s2822_s16, %s2863_s6 }
 0x324   : > { %p2465_p10 = scmp.lt.s32.totalorder %s2463_s9, %s2459_s26 }
 0x325   : > { %p2461_p7 = pnand %p2460_p4, %p2592_p5 }
 0x326   : > { %p2466_p11 = por %p2465_p10, %p2464_p9 }
 0x327   : > { %p2462_p8 = pneg %p2461_p7 }
 0x329   : > { %p2467_p12 = pnand %p2466_p11, %p2462_p8 }
 0x32b   : > { %2470 = shalt.err (!%p2467_p12)
}
 0x32c   : > { %2392 = dma.vmem_to_hbm [thread:$0]  (%p2592_p5), %s2154_s13, 16, %s2822_s16, %s2141_s17  }
 0x32d PF: > { %p2398_p13 = scmp.ge.s32.totalorder %s2505_s24, 2  ;;  %s2165_s12 = sand.u32 1, %s2493_s21  }
 0x32e   : > { %s2166_s14 = scalar_lea.sflag [#allocation3], %s2165_s12 }
 0x32f   : > { %p2395_p0 = pnand %p2398_p13, %p2596_p6 }
 0x331   : > { %p2396_p1 = pneg %p2395_p0 }
 0x333   : > { %2488 = dma.done.wait (%p2396_p1), %s2166_s14, 16  }
 0x334   : > { %2490 = vsyncadd (%p2396_p1), %s2166_s14, 4294967280  ;;  %p16_p2 = scmp.ge.s32.totalorder %s2579_s27, 4   ;;  %s2866_s21 = smov %s2497_s22 }
 0x335   : > { %s2867_s22 = smov %s2501_s23  ;;  %s2868_s23 = smov %s2590_s30 }
 0x336   : > { %s2869_s24 = smov %s2579_s27  ;;  %18 = sbr.rel (!%p16_p2) target bundleno = 3 (0x3), region = 87 }
 0x33b   :  { %2170 = vsyncpa [#allocation3], 1 }
 0x33c   :  { %2172 = vsyncpa [#allocation3 + $0x1], 1 }

</bundles_post_ra>
